<compile_context>
chip_gen: v7x
topology: tpu7x:2x2x1
jax: 0.10.0
libtpu: 0.0.40
codegen_flags: <defaults>
</compile_context>

<pallas_src>
import jax
import jax.numpy as jnp
import numpy as np
from jax.experimental import pallas as pl
from jax.experimental.pallas import tpu as pltpu

HIDDEN = 256
LANE = 128
SUBLANE = 8


def _round_up(x, m):
    return (x + m - 1) // m * m


def actor_kernel(x_ref, w1_ref, b1_ref, w2_ref, b2_ref, o_ref):
    # Layer 1: Linear(S, 256) + ReLU.
    # MXU operands in bf16 (native on all gens), f32 accumulation; elementwise in f32.
    x = x_ref[...].astype(jnp.bfloat16)
    h = jnp.dot(x, w1_ref[...], preferred_element_type=jnp.float32) + b1_ref[...]
    h = jnp.maximum(h, 0.0)
    # Layer 2: Linear(256, A_pad) + Tanh. Padded output lanes are tanh(0+0)=0 and
    # sliced off by the wrapper; A_pad=128 keeps the store a full (unmasked) vst.
    z = jnp.dot(h.astype(jnp.bfloat16), w2_ref[...],
                preferred_element_type=jnp.float32) + b2_ref[...]
    o_ref[...] = jnp.tanh(z).astype(o_ref.dtype)


def actor_forward(state, prepared_params, *, block_b=512, out_dtype=jnp.float32):
    """state: [B, S] f32 (unpadded).
    prepared_params: (w1 [S,H] bf16, b1 [1,H] f32, w2 [H,A_pad] bf16, b2 [1,A_pad] f32).
    Returns [B, A_pad]; caller slices to [:, :action_size].
    """
    w1, b1, w2, b2 = prepared_params
    B, S = state.shape
    assert w1.shape == (S, HIDDEN)
    A_pad = w2.shape[1]

    # Batch tile: large (fewer grid steps, ~85% of HBM roofline at 512+), but split
    # so the grid has >= 2 steps when the batch allows it (v7x: one tile per core).
    tm = min(block_b, _round_up(pl.cdiv(B, 2), SUBLANE))
    tm = max(tm, SUBLANE)
    grid = (pl.cdiv(B, tm),)  # ragged last tile handled by Pallas; no batch-pad copy

    cost = pl.CostEstimate(
        flops=2 * B * (S * HIDDEN + HIDDEN * A_pad),
        transcendentals=B * A_pad,
        bytes_accessed=(4 * B * S            # state read (f32)
                        + 2 * S * HIDDEN     # w1 (bf16)
                        + 4 * HIDDEN         # b1 (f32)
                        + 2 * HIDDEN * A_pad # w2 (bf16)
                        + 4 * A_pad          # b2 (f32)
                        + jnp.dtype(out_dtype).itemsize * B * A_pad),
    )

    return pl.pallas_call(
        actor_kernel,
        out_shape=jax.ShapeDtypeStruct((B, A_pad), out_dtype),
        grid=grid,
        in_specs=[
            pl.BlockSpec((tm, S), lambda i: (i, 0)),          # state tile (full feature dim)
            pl.BlockSpec((S, HIDDEN), lambda i: (0, 0)),      # w1: VMEM-resident across grid
            pl.BlockSpec((1, HIDDEN), lambda i: (0, 0)),      # b1
            pl.BlockSpec((HIDDEN, A_pad), lambda i: (0, 0)),  # w2 (zero-padded columns)
            pl.BlockSpec((1, A_pad), lambda i: (0, 0)),       # b2 (zero-padded lanes)
        ],
        out_specs=pl.BlockSpec((tm, A_pad), lambda i: (i, 0)),
        compiler_params=pltpu.CompilerParams(
            dimension_semantics=("parallel",),
        ),
        cost_estimate=cost,
    )(state, w1, b1, w2, b2)


def actor_apply(state, prepared_params, action_size):
    out = actor_forward(state, prepared_params)
    return out[:, :action_size]


def init_actor_params(key, state_size, action_size, hidden=HIDDEN):
    """Mirrors ActorNetwork.reset_parameters(); weights stored as [in, out] f32."""
    k1, k2, k3, k4 = jax.random.split(key, 4)
    lim1 = 1.0 / np.sqrt(hidden)  # hidden_init uses weight.size(0) == 256
    w1 = jax.random.uniform(k1, (state_size, hidden), jnp.float32, -lim1, lim1)
    b1 = jax.random.uniform(
        k2, (1, hidden), jnp.float32, -1.0 / np.sqrt(state_size), 1.0 / np.sqrt(state_size)
    )
    w2 = jax.random.uniform(k3, (hidden, action_size), jnp.float32, -3e-3, 3e-3)
    b2 = jax.random.uniform(
        k4, (1, action_size), jnp.float32, -1.0 / np.sqrt(hidden), 1.0 / np.sqrt(hidden)
    )
    return w1, b1, w2, b2


def prepare_actor_params(params, *, action_align=LANE):
    """One-time prep: w1/w2 -> bf16 MXU operands, w2/b2 output columns zero-padded
    to a lane-dense width. Biases stay f32 (f32 bias-add / accumulation)."""
    w1, b1, w2, b2 = params
    A = w2.shape[1]
    A_pad = _round_up(A, action_align)
    w1p = w1.astype(jnp.bfloat16)
    w2p = jnp.pad(w2, ((0, 0), (0, A_pad - A))).astype(jnp.bfloat16)
    b2p = jnp.pad(b2, ((0, 0), (0, A_pad - A)))
    return w1p, b1, w2p, b2p


def actor_reference(state, params):
    w1, b1, w2, b2 = params
    h = jnp.maximum(state @ w1 + b1, 0.0)
    return jnp.tanh(h @ w2 + b2)


if __name__ == "__main__":
    key = jax.random.PRNGKey(0)
    state_size, action_size = 33, 4  # e.g. Reacher env: 33-d state, 4-d action

    kp, kx1, kx2 = jax.random.split(key, 3)
    params = init_actor_params(kp, state_size, action_size)
    prepared = prepare_actor_params(params)

    # Small single-tile batch.
    state_small = jax.random.normal(kx1, (8, state_size), jnp.float32)
    out_small = jax.block_until_ready(actor_apply(state_small, prepared, action_size))
    ref_small = actor_reference(state_small, params)
    np.testing.assert_allclose(np.asarray(out_small), np.asarray(ref_small),
                               rtol=1e-2, atol=1e-2)
    assert out_small.shape == (8, action_size)

    # Larger ragged batch exercising the multi-tile grid (2 tiles of 152, last one partial).
    state_big = jax.random.normal(kx2, (300, state_size), jnp.float32)
    out_big = jax.block_until_ready(actor_apply(state_big, prepared, action_size))
    ref_big = actor_reference(state_big, params)
    np.testing.assert_allclose(np.asarray(out_big), np.asarray(ref_big),
                               rtol=1e-2, atol=1e-2)
    assert out_big.shape == (300, action_size)

    print("KERNEL_OK")
</pallas_src>

<mosaic_0001>
module attributes {stable_mosaic.version = 11 : i64} {
  func.func @actor_kernel(%arg0: i32, %arg1: memref<8x33xf32, #tpu.memory_space<vmem>>, %arg2: memref<33x256xbf16, #tpu.memory_space<vmem>>, %arg3: memref<1x256xf32, #tpu.memory_space<vmem>>, %arg4: memref<256x128xbf16, #tpu.memory_space<vmem>>, %arg5: memref<1x128xf32, #tpu.memory_space<vmem>>, %arg6: memref<8x128xf32, #tpu.memory_space<vmem>>) attributes {dimension_semantics = [#tpu.dimension_semantics<parallel>], iteration_bounds = array<i64: 1>, scalar_prefetch = 0 : i64, scratch_operands = 0 : i64, tpu.core_type = #tpu.core_type<tc>, window_params = [{transform_indices = @transform_0, window_bounds = array<i64: 8, 33>}, {pipeline_mode = #tpu.pipeline_mode<synchronous>, transform_indices = @transform_1, window_bounds = array<i64: 33, 256>}, {pipeline_mode = #tpu.pipeline_mode<synchronous>, transform_indices = @transform_2, window_bounds = array<i64: 1, 256>}, {pipeline_mode = #tpu.pipeline_mode<synchronous>, transform_indices = @transform_3, window_bounds = array<i64: 256, 128>}, {pipeline_mode = #tpu.pipeline_mode<synchronous>, transform_indices = @transform_4, window_bounds = array<i64: 1, 128>}, {transform_indices = @transform_5, window_bounds = array<i64: 8, 128>}]} {
    %c0 = arith.constant 0 : index
    %c0_0 = arith.constant 0 : index
    %0 = vector.load %arg1[%c0, %c0_0] : memref<8x33xf32, #tpu.memory_space<vmem>>, vector<8x33xf32>
    %1 = arith.truncf %0 : vector<8x33xf32> to vector<8x33xbf16>
    %c0_1 = arith.constant 0 : index
    %c0_2 = arith.constant 0 : index
    %2 = vector.load %arg2[%c0_1, %c0_2] : memref<33x256xbf16, #tpu.memory_space<vmem>>, vector<33x256xbf16>
    %cst = arith.constant dense<0.000000e+00> : vector<8x256xf32>
    %3 = tpu.matmul %1, %2, %cst {dimension_numbers = #tpu.dot_dimension_numbers<[1], [0], [0], [1], [0, 0, 1, 1], [], []>} : vector<8x33xbf16>, vector<33x256xbf16>, vector<8x256xf32> -> vector<8x256xf32>
    %c0_3 = arith.constant 0 : index
    %c0_4 = arith.constant 0 : index
    %4 = vector.load %arg3[%c0_3, %c0_4] : memref<1x256xf32, #tpu.memory_space<vmem>>, vector<1x256xf32>
    %5 = vector.broadcast %4 : vector<1x256xf32> to vector<8x256xf32>
    %6 = arith.addf %3, %5 : vector<8x256xf32>
    %cst_5 = arith.constant 0.000000e+00 : f32
    %7 = vector.broadcast %cst_5 : f32 to vector<8x256xf32>
    %8 = arith.maximumf %6, %7 : vector<8x256xf32>
    %9 = arith.truncf %8 : vector<8x256xf32> to vector<8x256xbf16>
    %c0_6 = arith.constant 0 : index
    %c0_7 = arith.constant 0 : index
    %10 = vector.load %arg4[%c0_6, %c0_7] : memref<256x128xbf16, #tpu.memory_space<vmem>>, vector<256x128xbf16>
    %cst_8 = arith.constant dense<0.000000e+00> : vector<8x128xf32>
    %11 = tpu.matmul %9, %10, %cst_8 {dimension_numbers = #tpu.dot_dimension_numbers<[1], [0], [0], [1], [0, 0, 1, 1], [], []>} : vector<8x256xbf16>, vector<256x128xbf16>, vector<8x128xf32> -> vector<8x128xf32>
    %c0_9 = arith.constant 0 : index
    %c0_10 = arith.constant 0 : index
    %12 = vector.load %arg5[%c0_9, %c0_10] : memref<1x128xf32, #tpu.memory_space<vmem>>, vector<1x128xf32>
    %13 = vector.broadcast %12 : vector<1x128xf32> to vector<8x128xf32>
    %14 = arith.addf %11, %13 : vector<8x128xf32>
    %15 = math.tanh %14 : vector<8x128xf32>
    %c0_11 = arith.constant 0 : index
    %c0_12 = arith.constant 0 : index
    %16 = vector.load %arg6[%c0_11, %c0_12] : memref<8x128xf32, #tpu.memory_space<vmem>>, vector<8x128xf32>
    tpu.vector_store %arg6[%c0_11, %c0_12], %15 {strides = array<i32>} : memref<8x128xf32, #tpu.memory_space<vmem>>, vector<8x128xf32>,
    return
  }
  func.func @transform_0(%arg0: i32) -> (i32, i32) {
    %c0_i32 = arith.constant 0 : i32
    %c0_i32_0 = arith.constant 0 : i32
    return %arg0, %c0_i32 : i32, i32
  }
  func.func @transform_1(%arg0: i32) -> (i32, i32) {
    %c0_i32 = arith.constant 0 : i32
    %c0_i32_0 = arith.constant 0 : i32
    %c0_i32_1 = arith.constant 0 : i32
    return %c0_i32, %c0_i32_0 : i32, i32
  }
  func.func @transform_2(%arg0: i32) -> (i32, i32) {
    %c0_i32 = arith.constant 0 : i32
    %c0_i32_0 = arith.constant 0 : i32
    %c0_i32_1 = arith.constant 0 : i32
    return %c0_i32, %c0_i32_0 : i32, i32
  }
  func.func @transform_3(%arg0: i32) -> (i32, i32) {
    %c0_i32 = arith.constant 0 : i32
    %c0_i32_0 = arith.constant 0 : i32
    %c0_i32_1 = arith.constant 0 : i32
    return %c0_i32, %c0_i32_0 : i32, i32
  }
  func.func @transform_4(%arg0: i32) -> (i32, i32) {
    %c0_i32 = arith.constant 0 : i32
    %c0_i32_0 = arith.constant 0 : i32
    %c0_i32_1 = arith.constant 0 : i32
    return %c0_i32, %c0_i32_0 : i32, i32
  }
  func.func @transform_5(%arg0: i32) -> (i32, i32) {
    %c0_i32 = arith.constant 0 : i32
    %c0_i32_0 = arith.constant 0 : i32
    return %arg0, %c0_i32 : i32, i32
  }
}

</mosaic_0001>

<bundles_post_ra>
// kernel: tpu_custom_call.1
= control target key start
LH: loop header
LB: loop body
LE: loop exit
PB: predicated region body
PF: predicated region fallthrough
CT: control target
= control target key end

     0   :  { %10 = vsyncpa [#allocation3], 0  ;;  %s624_s0 = inlined_call_operand.hbm [shape: f32[8,33], index: 0, kind: input, shape index: {}]   ;;  %s625_s1 = inlined_call_operand.hbm [shape: bf16[33,256], index: 1, kind: input, shape index: {}]   ;;  %s626_s2 = inlined_call_operand.vmem [shape: f32[1,256], index: 2, kind: input, shape index: {}]   ;;  %s627_s3 = inlined_call_operand.hbm [shape: bf16[256,128], index: 3, kind: input, shape index: {}]   ;;  %s628_s4 = inlined_call_operand.vmem [shape: f32[1,128], index: 4, kind: input, shape index: {}]   ;;  %s629_s5 = inlined_call_operand.hbm [shape: f32[8,128], index: 5, kind: output, shape index: {}]  }
   0x1   :  { %11 = vsyncpa [#allocation6], 0 }
   0x2   :  { %12 = vsyncpa [#allocation4], 0  ;;  %s531_s18 = smov [#allocation5]   ;;  %s437_s22 = scalar_lea.hbm %s625_s1, 640 }
   0x3   :  { %s28_s19 = sshll.u32 %s531_s18, 4  ;;  %p438_p0 = scmp.ne.s32.totalorder %s625_s1, %s437_s22  ;;  %s29_s19 = int_to_ptr.vmem [resolvable:$true] %s28_s19 }
   0x4   :  { %p441_p1 = scmp.lt.u32.totalorder %s437_s22, %s625_s1 }
   0x6   :  { %p443_p2 = pnand %p441_p1, %p438_p0 }
   0x8   :  { %446 = shalt.err (!%p443_p2)
}
   0x9   :  { %s447_s27 = scalar_lea.vmem %s29_s19, 640  ;;  %p452_p4 = scmp.lt.s32.totalorder %s29_s19, %s29_s19 }
   0xa   :  { %p448_p3 = scmp.ne.s32.totalorder %s29_s19, %s447_s27  ;;  %p453_p5 = scmp.lt.s32.totalorder %s447_s27, %s447_s27 }
   0xc   :  { %p454_p6 = por %p453_p5, %p452_p4 }
   0xe   :  { %p455_p7 = pnand %p454_p6, %p448_p3 }
  0x10   :  { %458 = shalt.err (!%p455_p7)
}
  0x11   :  { %s532_s28 = smov 128   ;;  %s533_s29 = smov 8  }
  0x12   :  { %34 = dma.hbm_to_vmem [thread:$0]  %s625_s1, 640, %s29_s19, [#allocation6], %s532_s28, %s532_s28, %s533_s29  }
  0x13   :  { %s534_s7 = smov [#allocation2]   ;;  %s535_s9 = smov [#allocation7]  }
  0x14   :  { %s19_s8 = sshll.u32 %s534_s7, 4  ;;  %s42_s10 = sshll.u32 %s535_s9, 4  ;;  %s20_s8 = int_to_ptr.vmem [resolvable:$true] %s19_s8  ;;  %s43_s10 = int_to_ptr.vmem [resolvable:$true] %s42_s10 }
  0x15   :  { %s459_s13 = scalar_lea.hbm %s624_s0, 128 }
  0x16   :  { %p460_p8 = scmp.ne.s32.totalorder %s624_s0, %s459_s13  ;;  %p463_p9 = scmp.lt.u32.totalorder %s459_s13, %s624_s0 }
  0x18   :  { %p465_p10 = pnand %p463_p9, %p460_p8 }
  0x1a   :  { %468 = shalt.err (!%p465_p10)
}
  0x1b   :  { %s469_s1 = scalar_lea.vmem %s20_s8, 128  ;;  %p474_p12 = scmp.lt.s32.totalorder %s20_s8, %s20_s8 }
  0x1c   :  { %p470_p11 = scmp.ne.s32.totalorder %s20_s8, %s469_s1  ;;  %p475_p13 = scmp.lt.s32.totalorder %s469_s1, %s469_s1 }
  0x1e   :  { %p476_p0 = por %p475_p13, %p474_p12 }
  0x20   :  { %p477_p1 = pnand %p476_p0, %p470_p11 }
  0x22   :  { %480 = shalt.err (!%p477_p1)
}
  0x23   :  { %22 = dma.hbm_to_vmem [thread:$0]  %s624_s0, 128, %s20_s8, [#allocation3]  }
  0x24   :  { %s481_s22 = scalar_lea.hbm %s627_s3, 2048 }
  0x25   :  { %p482_p2 = scmp.ne.s32.totalorder %s627_s3, %s481_s22  ;;  %p485_p3 = scmp.lt.u32.totalorder %s481_s22, %s627_s3 }
  0x27   :  { %p487_p4 = pnand %p485_p3, %p482_p2 }
  0x29   :  { %490 = shalt.err (!%p487_p4)
}
  0x2a   :  { %s491_s27 = scalar_lea.vmem %s43_s10, 2048  ;;  %p496_p6 = scmp.lt.s32.totalorder %s43_s10, %s43_s10 }
  0x2b   :  { %p492_p5 = scmp.ne.s32.totalorder %s43_s10, %s491_s27  ;;  %p497_p7 = scmp.lt.s32.totalorder %s491_s27, %s491_s27 }
  0x2d   :  { %p498_p8 = por %p497_p7, %p496_p6 }
  0x2f   :  { %p499_p9 = pnand %p498_p8, %p492_p5 }
  0x31   :  { %502 = shalt.err (!%p499_p9)
}
  0x32   :  { %s536_s0 = smov 64   ;;  %s537_s28 = smov 4  }
  0x33   :  { %48 = dma.hbm_to_vmem [thread:$0]  %s627_s3, 2048, %s43_s10, [#allocation6], %s536_s0, %s536_s0, %s537_s28  }
  0x34   :  { %525 = dma.done.wait [#allocation3], 128  }
  0x35   :  { %526 = vsyncadd [#allocation3], 4294967168 }
  0x36   :  { %527 = dma.done.wait [#allocation6], 2688  }
  0x37   :  { %528 = vsyncadd [#allocation6], 4294964608  ;;  %v538_v0 = vmov 0   ;;  %vm109_vm0 = vcmask 1040384   ;;  %v411_v1 = vld [vmem:[#allocation5 + $0x4] ss:$8 sps:$4 sm:$0xff]   ;;  %v70_v29 = vlaneseq }
  0x38   :  { %150 = vmatprep.mubr.bf16.mxu0 %v538_v0  ;;  %v413_v2 = vld [vmem:[#allocation5] ss:$8 sps:$4 sm:$0xff]   ;;  %118 = vmatprep.subr.bf16.mxu0 %v411_v1  ;;  %v414_v3 = vld [vmem:[#allocation5 + $0x14] ss:$8 sps:$4 sm:$0xff]   ;;  %v111_v5 = vsel %vm109_vm0, 65535, %v538_v0  ;;  %vm105_vm1 = vcmask 269312  }
  0x39   :  { %v67_v4 = vld [vmem:[#allocation5 + $0x20] sm:$0x11]  ;;  %119 = vmatpush1.bf16.msra.mxu0 %v413_v2  ;;  %v416_v6 = vld [vmem:[#allocation5 + $0x10] ss:$8 sps:$4 sm:$0xff]   ;;  %v419_v9 = vld [vmem:[#allocation7 + $0x40] sm:$0xff]   ;;  %v71_v30 = vshrl.u32 %v70_v29, 7 }
  0x3a   :  { %v361_v7 = vcombine.high %v67_v4, %v67_v4  ;;  %v360_v8 = vcombine.low %v67_v4, %v67_v4  ;;  %120 = vmatprep.subr.bf16.mxu0 %v414_v3  ;;  %v61_v11 = vld [vmem:[#allocation2] sm:$0xff]  ;;  %v420_v12 = vld [vmem:[#allocation7] sm:$0xff]   ;;  %380 = vmatprep.subr.bf16.mxu1 %v419_v9  ;;  %v421_v13 = vld [vmem:[#allocation7 + $0x48] sm:$0xff]  }
  0x3b   :  { %381 = vmatpush3.bf16.msra.mxu1 %v420_v12  ;;  %v422_v15 = vld [vmem:[#allocation7 + $0x8] sm:$0xff]   ;;  %v423_v16 = vld [vmem:[#allocation7 + $0x50] sm:$0xff]   ;;  %v62_v17 = vpack.c.bf16 %v61_v11, %v61_v11  ;;  %v425_v19 = vld [vmem:[#allocation7 + $0x58] sm:$0xff]   ;;  %v72_v31 = vsub.s32 0, %v71_v30  ;;  %v76_v33 = vsub.s32 1, %v71_v30 }
  0x3c   :  { %v116_v10 = vand.u32 %v361_v7, %v111_v5  ;;  %v113_v14 = vand.u32 %v360_v8, %v111_v5  ;;  %382 = vmatprep.subr.bf16.mxu1 %v421_v13  ;;  %v424_v18 = vld [vmem:[#allocation7 + $0x10] sm:$0xff]   ;;  %v426_v20 = vld [vmem:[#allocation7 + $0x18] sm:$0xff]   ;;  %v427_v21 = vld [vmem:[#allocation7 + $0x60] sm:$0xff]  }
  0x3d   :  { %121 = vmatpush1.bf16.msra.mxu0 %v416_v6  ;;  %v428_v22 = vld [vmem:[#allocation7 + $0x20] sm:$0xff]   ;;  %v429_v23 = vld [vmem:[#allocation7 + $0x68] sm:$0xff]   ;;  %v431_v25 = vld [vmem:[#allocation7 + $0x70] sm:$0xff]  }
  0x3e   :  { %122 = vmatprep.subr.bf16.mxu0 %v116_v10  ;;  %v430_v24 = vld [vmem:[#allocation7 + $0x28] sm:$0xff]   ;;  %v432_v26 = vld [vmem:[#allocation7 + $0x30] sm:$0xff]   ;;  %v433_v27 = vld [vmem:[#allocation7 + $0x78] sm:$0xff]  }
  0x3f   :  { %383 = vmatpush3.bf16.msra.mxu1 %v422_v15  ;;  %v434_v28 = vld [vmem:[#allocation7 + $0x38] sm:$0xff]   ;;  %v68_v32 = vld [vmem:[%s626_s2] sm:$0x3]  ;;  %s539_s2 = smov [#allocation8]  }
  0x40   :  { %384 = vmatprep.subr.bf16.mxu1 %v423_v16  ;;  %v73_v34 = vrot.slane %v68_v32, %v72_v31  ;;  %v77_v35 = vrot.slane %v68_v32, %v76_v33  ;;  %v363_v47 = vld [vmem:[%s628_s4] ss:$0 sm:$0xff]  ;;  %s346_s9 = sshll.u32 %s539_s2, 4  ;;  %s347_s9 = int_to_ptr.vmem [resolvable:$true] %s346_s9 }
  0x41   :  { %123 = vmatpush1.bf16.msra.mxu0 %v113_v14  ;;  %s503_s10 = scalar_lea.vmem %s347_s9, 128  ;;  %p508_p11 = scmp.lt.s32.totalorder %s347_s9, %s347_s9 }
  0x42   :  { %p504_p10 = scmp.ne.s32.totalorder %s347_s9, %s503_s10  ;;  %p509_p12 = scmp.lt.s32.totalorder %s503_s10, %s503_s10 }
  0x43   :  { %385 = vmatpush3.bf16.msra.mxu1 %v424_v18 }
  0x44   :  { %362 = vmatmul.mubr.msk.bf16.vlgmr.msra.gmra.mrb[0].mxu0 %vm105_vm1, %v62_v17  ;;  %386 = vmatprep.subr.bf16.mxu1 %v425_v19  ;;  %p510_p13 = por %p509_p12, %p508_p11 }
  0x46   :  { %p511_p0 = pnand %p510_p13, %p504_p10 }
  0x47   :  { %387 = vmatpush3.bf16.msra.mxu1 %v426_v20 }
  0x48   :  { %388 = vmatprep.subr.bf16.mxu1 %v427_v21 }
  0x4b   :  { %389 = vmatpush3.bf16.msra.mxu1 %v428_v22 }
  0x4c   :  { %390 = vmatprep.subr.bf16.mxu1 %v429_v23 }
  0x4f   :  { %391 = vmatpush3.bf16.msra.mxu1 %v430_v24 }
  0x50   :  { %392 = vmatprep.subr.bf16.mxu1 %v431_v25 }
  0x53   :  { %393 = vmatpush3.bf16.msra.mxu1 %v432_v26 }
  0x54   :  { %394 = vmatprep.subr.bf16.mxu1 %v433_v27 }
  0x57   :  { %395 = vmatpush3.bf16.msra.mxu1 %v434_v28 }
 0x117   :  { %v152_v36 = vpop.f32.mrb[0].mxu0 }
 0x118   :  { %v153_v37 = vadd.f32 %v152_v36, %v73_v34  ;;  %v154_v38 = vpop.f32.mrb[1].mxu0 }
 0x119   :  { %v155_v39 = vadd.f32 %v154_v38, %v77_v35  ;;  %v156_v40 = vpop.f32.mrb[2].mxu0 }
 0x11a   :  { %v159_v41 = vmax.f32 %v153_v37, 0.0  ;;  %v157_v42 = vpop.f32.mrb[3].mxu0 }
 0x11b   :  { %v160_v43 = vmax.f32 %v155_v39, 0.0 }
 0x11c   :  { %v161_v45 = vpack.c.bf16 %v159_v41, %v159_v41 }
 0x11d   :  { %v162_v44 = vpack.c.bf16 %v160_v43, %v160_v43 }
 0x11f   :  { %330 = vmatprep.mubr.bf16.mxu1 %v162_v44 }
 0x120   :  { %331 = vmatmul.mubr.bf16.vlgmr.msra.gmra.mrb[0].mxu1 %v161_v45 }
 0x1f3   :  { %v396_v46 = vpop.f32.mrb[0].mxu1 }
 0x1f4   :  { %v397_v48 = vpop.f32.mrb[1].mxu1 }
 0x1f5   :  { %v398_v49 = vadd.f32 %v397_v48, %v396_v46  ;;  %v399_v50 = vpop.f32.mrb[2].mxu1 }
 0x1f6   :  { %v400_v51 = vpop.f32.mrb[3].mxu1 }
 0x1f7   :  { %v333_v52 = vadd.f32 %v398_v49, %v363_v47 }
 0x1f9   :  { %435 = vtanh.f32 %v333_v52 }
 0x203   :  { %v436_v53 = vpop.eup %435 }
 0x204   :  { %339 = vst [vmem:[#allocation8] sm:$0xff] %v436_v53 }
 0x205   :  { %514 = shalt.err (!%p511_p0)
}
 0x206   :  { %s515_s12 = scalar_lea.hbm %s629_s5, 128 }
 0x207   :  { %p516_p1 = scmp.ne.s32.totalorder %s629_s5, %s515_s12  ;;  %p519_p2 = scmp.lt.u32.totalorder %s515_s12, %s629_s5 }
 0x209   :  { %p521_p3 = pnand %p519_p2, %p516_p1 }
 0x20b   :  { %524 = shalt.err (!%p521_p3)
}
 0x20c   :  { %349 = dma.vmem_to_hbm [thread:$0]  %s347_s9, 128, %s629_s5, [#allocation4]  }
 0x20d   :  { %529 = dma.done.wait [#allocation4], 128  }
 0x20e   :  { %530 = vsyncadd [#allocation4], 4294967168 }
 0x20f   :  { %353 = vsyncpa [#allocation3], 1 }
 0x210   :  { %354 = vsyncpa [#allocation6], 1 }
 0x211   :  { %355 = vsyncpa [#allocation4], 1 }

</bundles_post_ra>
